<compile_context>
chip_gen: v7x
topology: tpu7x:2x2x1
jax: 0.10.0
libtpu: 0.0.40
codegen_flags: <defaults>
</compile_context>

<pallas_src>
import functools

import jax
import jax.numpy as jnp
from jax import lax
from jax.experimental import pallas as pl
from jax.experimental.pallas import tpu as pltpu
import numpy as np

# deterministic "cost_weight" buffer init (class / mask / dice weights)
COST_WEIGHT = (0.5, 1.0, 1.0)

# Padding logit for the points axis / padded query rows:
# softplus(_PAD_LOGIT) == 0 and sigmoid(_PAD_LOGIT) == 0 exactly in f32, so padded
# points contribute nothing to any accumulated term.
_PAD_LOGIT = -1.0e4

# Lane tile over the points axis. Sweep {2048, 4096, 8192} on v5e/v6e (128 MiB VMEM);
# keep <= 2048 on v7x (64 MiB VMEM). At n_q~400 f32 + n_inst~128 bf16 this is only a
# few MiB per double-buffered step, well under the default scoped VMEM limit.
_BLK_N_MAX = 2048


def _round_up(x, m):
    return (x + m - 1) // m * m


def _nm_dot(a, b):
    # einsum('nc,mc->nm', a, b) on the MXU, f32 accumulate
    return lax.dot_general(
        a, b, dimension_numbers=(((1,), (1,)), ((), ())),
        preferred_element_type=jnp.float32)


def matcher_cost_kernel(pred_label_ref, pred_mask_ref, tgt_mask_ref,
                        tgt_onehot_ref, out_ref,
                        acc_dot_ref, acc_sp_ref, acc_s_ref,
                        *, w_mask, w_dice, inv_n_points):
    k = pl.program_id(1)

    @pl.when(k == 0)
    def _init():
        acc_dot_ref[...] = jnp.zeros_like(acc_dot_ref)
        acc_sp_ref[...] = jnp.zeros_like(acc_sp_ref)
        acc_s_ref[...] = jnp.zeros_like(acc_s_ref)

    pm = pred_mask_ref[...]          # (n_q_pad, blk_n)     f32 mask logits
    tm = tgt_mask_ref[...]           # (n_inst_pad, blk_n)  bf16 binary targets
    n_q = pm.shape[0]
    blk = pm.shape[1]

    # Single transcendental chain (EUP has one slot per bundle):
    #   pos = softplus(-x);  sigmoid(x) = exp(-pos);  softplus(x) = x + pos
    pos = jax.nn.softplus(-pm)
    s = jnp.exp(-pos)
    acc_sp_ref[...] += jnp.sum(pm + pos, axis=-1, keepdims=True)   # rowsum softplus(x)
    acc_s_ref[...] += jnp.sum(s, axis=-1, keepdims=True)           # rowsum sigmoid(x)

    # Fused K=blk contraction on the MXU (bf16 operands, f32 accumulate):
    #   rows [0, n_q)      : x . t^T        (BCE term)
    #   rows [n_q, 2 n_q)  : sigmoid . t^T  (dice numerator)
    #   row  2 n_q         : colwise sum of t (dice denominator); 8 ones rows keep
    #                        the accumulator sublane-aligned, only row 0 is used.
    lhs = jnp.concatenate(
        [pm.astype(jnp.bfloat16),
         s.astype(jnp.bfloat16),
         jnp.ones((8, blk), dtype=jnp.bfloat16)], axis=0)
    acc_dot_ref[...] += _nm_dot(lhs, tm)

    @pl.when(k == pl.num_programs(1) - 1)
    def _finalize():
        # ---- cost_class: -w_class * softmax(logits)[:, tgt] as a matmul with the
        # (already -w_class scaled) one-hot label matrix.
        logits = pred_label_ref[...]                 # (n_q_pad, n_cls)
        toh = tgt_onehot_ref[...]                    # (n_inst_pad, n_cls)
        m = jnp.max(logits, axis=-1, keepdims=True)
        e = jnp.exp(logits - m)
        sm = e * pl.reciprocal(jnp.sum(e, axis=-1, keepdims=True), approx=True)
        class_term = _nm_dot(sm, toh)                # (n_q_pad, n_inst_pad)

        pm_dot = acc_dot_ref[pl.ds(0, n_q), :]           # x . t^T
        s_dot = acc_dot_ref[pl.ds(n_q, n_q), :]          # sigmoid . t^T
        tm_sum = acc_dot_ref[pl.ds(2 * n_q, 1), :]       # (1, n_inst_pad) colsum(t)

        # cost_mask = (-x.t + rowsum(softplus(x))) / N
        cost_mask = (acc_sp_ref[...] - pm_dot) * inv_n_points
        # cost_dice = 1 - (2*sigmoid.t + 1) / (rowsum(sigmoid) + colsum(t) + 1)
        denom = acc_s_ref[...] + tm_sum + 1.0
        cost_dice = 1.0 - (2.0 * s_dot + 1.0) / denom

        out_ref[...] = (class_term + w_mask * cost_mask
                        + w_dice * cost_dice).astype(out_ref.dtype)


@functools.partial(jax.jit, static_argnames=("cost_weight", "blk_n_max"))
def hungarian_cost_matrix(pred_labels, pred_masks, tgt_masks, tgt_onehot,
                          cost_weight=COST_WEIGHT, blk_n_max=_BLK_N_MAX):
    """Cost matrices C of shape (B, n_q, n_inst), computed in Pallas.

    pred_labels: (B, n_q, n_cls) f32, pred_masks: (B, n_q, N) f32 logits,
    tgt_masks: (B, n_inst, N) {0,1} f32, tgt_onehot: (B, n_inst, n_cls) f32.
    """
    B, n_q, n_cls = pred_labels.shape
    _, _, n_pts = pred_masks.shape
    _, n_inst, _ = tgt_masks.shape

    n_q_pad = _round_up(n_q, 8)
    n_inst_pad = _round_up(n_inst, 128)          # lane-dense output / MXU N dim
    blk_n = min(blk_n_max, _round_up(n_pts, 128))
    n_pts_pad = _round_up(n_pts, blk_n)
    n_k = n_pts_pad // blk_n

    # Pad: padded points/queries use _PAD_LOGIT so softplus/sigmoid contribute 0;
    # padded instance rows are all-zero (sliced away before assignment).
    pred_labels_p = jnp.pad(
        pred_labels, ((0, 0), (0, n_q_pad - n_q), (0, 0)))
    pred_masks_p = jnp.pad(
        pred_masks, ((0, 0), (0, n_q_pad - n_q), (0, n_pts_pad - n_pts)),
        constant_values=_PAD_LOGIT)
    tgt_masks_p = jnp.pad(
        tgt_masks, ((0, 0), (0, n_inst_pad - n_inst), (0, n_pts_pad - n_pts))
    ).astype(jnp.bfloat16)                        # binary -> exact in bf16, halves HBM
    toh_scaled = (-float(cost_weight[0])) * tgt_onehot   # fold -w_class into the matmul
    tgt_onehot_p = jnp.pad(
        toh_scaled, ((0, 0), (0, n_inst_pad - n_inst), (0, 0)))

    kernel = functools.partial(
        matcher_cost_kernel,
        w_mask=float(cost_weight[1]),
        w_dice=float(cost_weight[2]),
        inv_n_points=1.0 / float(n_pts))

    c_pad = pl.pallas_call(
        kernel,
        out_shape=jax.ShapeDtypeStruct((B, n_q_pad, n_inst_pad), jnp.float32),
        grid_spec=pltpu.PrefetchScalarGridSpec(
            num_scalar_prefetch=0,
            grid=(B, n_k),
            in_specs=[
                pl.BlockSpec((None, n_q_pad, n_cls), lambda b, k: (b, 0, 0)),
                pl.BlockSpec((None, n_q_pad, blk_n), lambda b, k: (b, 0, k)),
                pl.BlockSpec((None, n_inst_pad, blk_n), lambda b, k: (b, 0, k)),
                pl.BlockSpec((None, n_inst_pad, n_cls), lambda b, k: (b, 0, 0)),
            ],
            out_specs=pl.BlockSpec((None, n_q_pad, n_inst_pad),
                                   lambda b, k: (b, 0, 0)),
            scratch_shapes=[
                pltpu.VMEM((2 * n_q_pad + 8, n_inst_pad), jnp.float32),  # fused dots
                pltpu.VMEM((n_q_pad, 1), jnp.float32),                   # sum softplus
                pltpu.VMEM((n_q_pad, 1), jnp.float32),                   # sum sigmoid
            ]),
        compiler_params=pltpu.CompilerParams(
            dimension_semantics=("parallel", "arbitrary")),
    )(pred_labels_p, pred_masks_p, tgt_masks_p, tgt_onehot_p)

    # Slice padding away on device (padded query rows / instance cols are garbage
    # and must never reach the assignment solver).
    return c_pad[:, :n_q, :n_inst]


def _linear_sum_assignment_host(cost_np):
    """Host-side Hungarian matching (not a TPU op)."""
    try:
        from scipy.optimize import linear_sum_assignment
        return linear_sum_assignment(cost_np)
    except Exception:
        # TODO(synk): greedy fallback when scipy is unavailable; not the exact
        # Hungarian optimum, only used so the demo remains self-contained.
        n_q, n_inst = cost_np.shape
        rows, cols = [], []
        used_r, used_c = set(), set()
        order = np.argsort(cost_np, axis=None)
        for flat in order:
            r, c = divmod(int(flat), n_inst)
            if r in used_r or c in used_c:
                continue
            rows.append(r); cols.append(c)
            used_r.add(r); used_c.add(c)
            if len(cols) == n_inst:
                break
        return np.asarray(rows, np.int64), np.asarray(cols, np.int64)


def hungarian_matcher_forward(pred_labels, pred_masks, gt_labels, gt_spmasks,
                              cost_weight=COST_WEIGHT):
    """Mirrors HungarianMatcher.forward for fixed-size synthetic instances.

    pred_labels: (B, n_q, n_cls), pred_masks: (B, n_q, N) logits,
    gt_labels: (B, n_inst) int32, gt_spmasks: (B, n_inst, N) {0,1} float32.
    Returns list of (row_idx, col_idx) int64 numpy arrays, one per batch.
    """
    n_cls = pred_labels.shape[-1]
    tgt_onehot = jax.nn.one_hot(gt_labels, n_cls, dtype=jnp.float32)
    C = hungarian_cost_matrix(pred_labels, pred_masks,
                              gt_spmasks.astype(jnp.float32),
                              tgt_onehot, cost_weight)
    # Per-batch host transfer so scipy on batch b overlaps the copy of batch b+1.
    indices = []
    for b in range(C.shape[0]):
        indices.append(_linear_sum_assignment_host(np.asarray(C[b])))
    return indices


def _cost_matrix_ref_np(pred_labels, pred_masks, gt_labels, gt_spmasks, w):
    """Pure NumPy reference of the PyTorch cost math."""
    pl_np = np.asarray(pred_labels, np.float64)
    pm_np = np.asarray(pred_masks, np.float64)
    tm_np = np.asarray(gt_spmasks, np.float64)
    lbl = np.asarray(gt_labels)
    B = pl_np.shape[0]
    out = []
    for b in range(B):
        x = pl_np[b] - pl_np[b].max(-1, keepdims=True)
        sm = np.exp(x); sm /= sm.sum(-1, keepdims=True)
        cost_class = -sm[:, lbl[b]]
        pm_b, tm_b = pm_np[b], tm_np[b]
        pos = np.logaddexp(0.0, -pm_b)
        neg = np.logaddexp(0.0, pm_b)
        cost_mask = (pos @ tm_b.T + neg @ (1.0 - tm_b).T) / pm_b.shape[1]
        s = 1.0 / (1.0 + np.exp(-pm_b))
        num = 2.0 * (s @ tm_b.T)
        den = s.sum(-1)[:, None] + tm_b.sum(-1)[None, :]
        cost_dice = 1.0 - (num + 1.0) / (den + 1.0)
        out.append(w[0] * cost_class + w[1] * cost_mask + w[2] * cost_dice)
    return np.stack(out)


if __name__ == "__main__":
    B, n_q, n_cls, N, n_inst = 2, 16, 19, 256, 8

    key = jax.random.PRNGKey(0)
    k1, k2, k3, k4 = jax.random.split(key, 4)
    pred_labels = jax.random.normal(k1, (B, n_q, n_cls), dtype=jnp.float32)
    pred_masks = jax.random.normal(k2, (B, n_q, N), dtype=jnp.float32)
    gt_labels = jax.random.randint(k3, (B, n_inst), 0, n_cls, dtype=jnp.int32)
    gt_spmasks = (jax.random.uniform(k4, (B, n_inst, N)) > 0.5).astype(jnp.float32)

    # Run the Pallas kernel once and block on the result.
    tgt_onehot = jax.nn.one_hot(gt_labels, n_cls, dtype=jnp.float32)
    C = hungarian_cost_matrix(pred_labels, pred_masks, gt_spmasks, tgt_onehot)
    C = jax.block_until_ready(C)

    # Numerical check against the PyTorch-equivalent reference (bf16 matmul operands
    # + approx reciprocal softmax give ~1e-3 deviations; loose tolerance).
    C_ref = _cost_matrix_ref_np(pred_labels, pred_masks, gt_labels, gt_spmasks,
                                COST_WEIGHT)
    np.testing.assert_allclose(np.asarray(C), C_ref, rtol=2e-2, atol=2e-2)

    # Full forward (cost kernel + host Hungarian assignment).
    indices = hungarian_matcher_forward(pred_labels, pred_masks,
                                        gt_labels, gt_spmasks)
    assert len(indices) == B
    for rows, cols in indices:
        assert len(rows) == n_inst and len(set(cols.tolist())) == n_inst

    print("KERNEL_OK")
</pallas_src>

<mosaic_0001>
module attributes {stable_mosaic.version = 11 : i64} {
  func.func @matcher_cost_kernel(%arg0: i32, %arg1: i32, %arg2: memref<1x16x19xf32, #tpu.memory_space<vmem>>, %arg3: memref<1x16x256xf32, #tpu.memory_space<vmem>>, %arg4: memref<1x128x256xbf16, #tpu.memory_space<vmem>>, %arg5: memref<1x128x19xf32, #tpu.memory_space<vmem>>, %arg6: memref<1x16x128xf32, #tpu.memory_space<vmem>>, %arg7: memref<40x128xf32, #tpu.memory_space<vmem>>, %arg8: memref<16x1xf32, #tpu.memory_space<vmem>>, %arg9: memref<16x1xf32, #tpu.memory_space<vmem>>) attributes {dimension_semantics = [#tpu.dimension_semantics<parallel>, #tpu.dimension_semantics<arbitrary>], iteration_bounds = array<i64: 2, 1>, scalar_prefetch = 0 : i64, scratch_operands = 3 : i64, tpu.core_type = #tpu.core_type<tc>, window_params = [{transform_indices = @transform_0, window_bounds = array<i64: 1, 16, 19>}, {transform_indices = @transform_1, window_bounds = array<i64: 1, 16, 256>}, {transform_indices = @transform_2, window_bounds = array<i64: 1, 128, 256>}, {transform_indices = @transform_3, window_bounds = array<i64: 1, 128, 19>}, {transform_indices = @transform_4, window_bounds = array<i64: 1, 16, 128>}]} {
    %c0_i32 = arith.constant 0 : i32
    %0 = arith.cmpi eq, %arg1, %c0_i32 : i32
    %1 = arith.extui %0 : i1 to i32
    %c0_i32_0 = arith.constant 0 : i32
    %2 = arith.cmpi ne, %1, %c0_i32_0 : i32
    scf.if %2 {
      %cst_27 = arith.constant 0.000000e+00 : f32
      %48 = vector.broadcast %cst_27 : f32 to vector<40x128xf32>
      %c0_28 = arith.constant 0 : index
      %c0_29 = arith.constant 0 : index
      %49 = vector.load %arg7[%c0_28, %c0_29] : memref<40x128xf32, #tpu.memory_space<vmem>>, vector<40x128xf32>
      tpu.vector_store %arg7[%c0_28, %c0_29], %48 {strides = array<i32>} : memref<40x128xf32, #tpu.memory_space<vmem>>, vector<40x128xf32>,
      %cst_30 = arith.constant 0.000000e+00 : f32
      %50 = vector.broadcast %cst_30 : f32 to vector<16x1xf32>
      %c0_31 = arith.constant 0 : index
      %c0_32 = arith.constant 0 : index
      %51 = vector.load %arg8[%c0_31, %c0_32] : memref<16x1xf32, #tpu.memory_space<vmem>>, vector<16x1xf32>
      tpu.vector_store %arg8[%c0_31, %c0_32], %50 {strides = array<i32>} : memref<16x1xf32, #tpu.memory_space<vmem>>, vector<16x1xf32>,
      %cst_33 = arith.constant 0.000000e+00 : f32
      %52 = vector.broadcast %cst_33 : f32 to vector<16x1xf32>
      %c0_34 = arith.constant 0 : index
      %c0_35 = arith.constant 0 : index
      %53 = vector.load %arg9[%c0_34, %c0_35] : memref<16x1xf32, #tpu.memory_space<vmem>>, vector<16x1xf32>
      tpu.vector_store %arg9[%c0_34, %c0_35], %52 {strides = array<i32>} : memref<16x1xf32, #tpu.memory_space<vmem>>, vector<16x1xf32>,
    } else {
    }
    %c0 = arith.constant 0 : index
    %c0_1 = arith.constant 0 : index
    %c0_2 = arith.constant 0 : index
    %3 = vector.load %arg3[%c0, %c0_1, %c0_2] : memref<1x16x256xf32, #tpu.memory_space<vmem>>, vector<1x16x256xf32>
    %4 = vector.shape_cast %3 : vector<1x16x256xf32> to vector<16x256xf32>
    %c0_3 = arith.constant 0 : index
    %c0_4 = arith.constant 0 : index
    %c0_5 = arith.constant 0 : index
    %5 = vector.load %arg4[%c0_3, %c0_4, %c0_5] : memref<1x128x256xbf16, #tpu.memory_space<vmem>>, vector<1x128x256xbf16>
    %6 = vector.shape_cast %5 : vector<1x128x256xbf16> to vector<128x256xbf16>
    %cst = arith.constant 0.000000e+00 : f32
    %7 = vector.broadcast %cst : f32 to vector<16x256xf32>
    %8 = arith.subf %7, %4 : vector<16x256xf32>
    %cst_6 = arith.constant 0.000000e+00 : f32
    %9 = vector.broadcast %cst_6 : f32 to vector<16x256xf32>
    %10 = arith.maximumf %8, %9 : vector<16x256xf32>
    %11 = vector.broadcast %cst_6 : f32 to vector<16x256xf32>
    %12 = arith.subf %8, %11 : vector<16x256xf32>
    %13 = arith.cmpf one, %12, %12 : vector<16x256xf32>
    %14 = vector.broadcast %cst_6 : f32 to vector<16x256xf32>
    %15 = arith.addf %8, %14 : vector<16x256xf32>
    %16 = math.absf %12 : vector<16x256xf32>
    %cst_7 = arith.constant 0.000000e+00 : f32
    %17 = vector.broadcast %cst_7 : f32 to vector<16x256xf32>
    %18 = arith.subf %17, %16 : vector<16x256xf32>
    %19 = math.exp %18 : vector<16x256xf32>
    %20 = math.log1p %19 : vector<16x256xf32>
    %21 = arith.addf %10, %20 : vector<16x256xf32>
    %22 = arith.select %13, %15, %21 : vector<16x256xi1>, vector<16x256xf32>
    %cst_8 = arith.constant 0.000000e+00 : f32
    %23 = vector.broadcast %cst_8 : f32 to vector<16x256xf32>
    %24 = arith.subf %23, %22 : vector<16x256xf32>
    %25 = math.exp %24 : vector<16x256xf32>
    %c0_9 = arith.constant 0 : index
    %c0_10 = arith.constant 0 : index
    %26 = vector.load %arg8[%c0_9, %c0_10] : memref<16x1xf32, #tpu.memory_space<vmem>>, vector<16x1xf32>
    %27 = arith.addf %4, %22 : vector<16x256xf32>
    %cst_11 = arith.constant dense<0.000000e+00> : vector<16xf32>
    %28 = vector.multi_reduction <add>, %27, %cst_11 [1] : vector<16x256xf32> to vector<16xf32>
    %29 = vector.shape_cast %28 : vector<16xf32> to vector<16x1xf32>
    %30 = arith.addf %26, %29 : vector<16x1xf32>
    %c0_12 = arith.constant 0 : index
    %c0_13 = arith.constant 0 : index
    %31 = vector.load %arg8[%c0_12, %c0_13] : memref<16x1xf32, #tpu.memory_space<vmem>>, vector<16x1xf32>
    tpu.vector_store %arg8[%c0_12, %c0_13], %30 {strides = array<i32>} : memref<16x1xf32, #tpu.memory_space<vmem>>, vector<16x1xf32>,
    %c0_14 = arith.constant 0 : index
    %c0_15 = arith.constant 0 : index
    %32 = vector.load %arg9[%c0_14, %c0_15] : memref<16x1xf32, #tpu.memory_space<vmem>>, vector<16x1xf32>
    %cst_16 = arith.constant dense<0.000000e+00> : vector<16xf32>
    %33 = vector.multi_reduction <add>, %25, %cst_16 [1] : vector<16x256xf32> to vector<16xf32>
    %34 = vector.shape_cast %33 : vector<16xf32> to vector<16x1xf32>
    %35 = arith.addf %32, %34 : vector<16x1xf32>
    %c0_17 = arith.constant 0 : index
    %c0_18 = arith.constant 0 : index
    %36 = vector.load %arg9[%c0_17, %c0_18] : memref<16x1xf32, #tpu.memory_space<vmem>>, vector<16x1xf32>
    tpu.vector_store %arg9[%c0_17, %c0_18], %35 {strides = array<i32>} : memref<16x1xf32, #tpu.memory_space<vmem>>, vector<16x1xf32>,
    %37 = arith.truncf %4 : vector<16x256xf32> to vector<16x256xbf16>
    %38 = arith.truncf %25 : vector<16x256xf32> to vector<16x256xbf16>
    %cst_19 = arith.constant 1.000000e+00 : bf16
    %39 = vector.broadcast %cst_19 : bf16 to vector<8x256xbf16>
    %40 = tpu.concatenate %37, %38, %39 in 0 : vector<16x256xbf16>, vector<16x256xbf16>, vector<8x256xbf16> -> vector<40x256xbf16>
    %c0_20 = arith.constant 0 : index
    %c0_21 = arith.constant 0 : index
    %41 = vector.load %arg7[%c0_20, %c0_21] : memref<40x128xf32, #tpu.memory_space<vmem>>, vector<40x128xf32>
    %cst_22 = arith.constant dense<0.000000e+00> : vector<40x128xf32>
    %42 = tpu.matmul %40, %6, %cst_22 {dimension_numbers = #tpu.dot_dimension_numbers<[1], [1], [0], [0], [0, 0, 1, 0], [], []>} : vector<40x256xbf16>, vector<128x256xbf16>, vector<40x128xf32> -> vector<40x128xf32>
    %43 = arith.addf %41, %42 : vector<40x128xf32>
    %c0_23 = arith.constant 0 : index
    %c0_24 = arith.constant 0 : index
    %44 = vector.load %arg7[%c0_23, %c0_24] : memref<40x128xf32, #tpu.memory_space<vmem>>, vector<40x128xf32>
    tpu.vector_store %arg7[%c0_23, %c0_24], %43 {strides = array<i32>} : memref<40x128xf32, #tpu.memory_space<vmem>>, vector<40x128xf32>,
    %c0_i32_25 = arith.constant 0 : i32
    %45 = arith.cmpi eq, %arg1, %c0_i32_25 : i32
    %46 = arith.extui %45 : i1 to i32
    %c0_i32_26 = arith.constant 0 : i32
    %47 = arith.cmpi ne, %46, %c0_i32_26 : i32
    scf.if %47 {
      %c0_27 = arith.constant 0 : index
      %c0_28 = arith.constant 0 : index
      %c0_29 = arith.constant 0 : index
      %48 = vector.load %arg2[%c0_27, %c0_28, %c0_29] : memref<1x16x19xf32, #tpu.memory_space<vmem>>, vector<1x16x19xf32>
      %49 = vector.shape_cast %48 : vector<1x16x19xf32> to vector<16x19xf32>
      %c0_30 = arith.constant 0 : index
      %c0_31 = arith.constant 0 : index
      %c0_32 = arith.constant 0 : index
      %50 = vector.load %arg5[%c0_30, %c0_31, %c0_32] : memref<1x128x19xf32, #tpu.memory_space<vmem>>, vector<1x128x19xf32>
      %51 = vector.shape_cast %50 : vector<1x128x19xf32> to vector<128x19xf32>
      %cst_33 = arith.constant dense<0xFF800000> : vector<16xf32>
      %52 = vector.multi_reduction <maximumf>, %49, %cst_33 [1] : vector<16x19xf32> to vector<16xf32>
      %53 = vector.shape_cast %52 : vector<16xf32> to vector<16x1xf32>
      %54 = vector.broadcast %53 : vector<16x1xf32> to vector<16x19xf32>
      %55 = arith.subf %49, %54 : vector<16x19xf32>
      %56 = math.exp %55 : vector<16x19xf32>
      %cst_34 = arith.constant dense<0.000000e+00> : vector<16xf32>
      %57 = vector.multi_reduction <add>, %56, %cst_34 [1] : vector<16x19xf32> to vector<16xf32>
      %58 = vector.shape_cast %57 : vector<16xf32> to vector<16x1xf32>
      %59 = tpu.reciprocal %58 {approx = true} : vector<16x1xf32> -> vector<16x1xf32>
      %60 = vector.broadcast %59 : vector<16x1xf32> to vector<16x19xf32>
      %61 = arith.mulf %56, %60 : vector<16x19xf32>
      %cst_35 = arith.constant dense<0.000000e+00> : vector<16x128xf32>
      %62 = tpu.matmul %61, %51, %cst_35 {dimension_numbers = #tpu.dot_dimension_numbers<[1], [1], [0], [0], [0, 0, 1, 0], [], []>} : vector<16x19xf32>, vector<128x19xf32>, vector<16x128xf32> -> vector<16x128xf32>
      %c0_36 = arith.constant 0 : index
      %c0_37 = arith.constant 0 : index
      %63 = vector.load %arg7[%c0_36, %c0_37] : memref<40x128xf32, #tpu.memory_space<vmem>>, vector<16x128xf32>
      %c16 = arith.constant 16 : index
      %c0_38 = arith.constant 0 : index
      %64 = vector.load %arg7[%c16, %c0_38] : memref<40x128xf32, #tpu.memory_space<vmem>>, vector<16x128xf32>
      %c32 = arith.constant 32 : index
      %c0_39 = arith.constant 0 : index
      %65 = vector.load %arg7[%c32, %c0_39] : memref<40x128xf32, #tpu.memory_space<vmem>>, vector<1x128xf32>
      %c0_40 = arith.constant 0 : index
      %c0_41 = arith.constant 0 : index
      %66 = vector.load %arg8[%c0_40, %c0_41] : memref<16x1xf32, #tpu.memory_space<vmem>>, vector<16x1xf32>
      %67 = vector.broadcast %66 : vector<16x1xf32> to vector<16x128xf32>
      %68 = arith.subf %67, %63 : vector<16x128xf32>
      %cst_42 = arith.constant 3.906250e-03 : f32
      %69 = vector.broadcast %cst_42 : f32 to vector<16x128xf32>
      %70 = arith.mulf %68, %69 : vector<16x128xf32>
      %c0_43 = arith.constant 0 : index
      %c0_44 = arith.constant 0 : index
      %71 = vector.load %arg9[%c0_43, %c0_44] : memref<16x1xf32, #tpu.memory_space<vmem>>, vector<16x1xf32>
      %72 = vector.broadcast %71 : vector<16x1xf32> to vector<16x128xf32>
      %73 = vector.broadcast %65 : vector<1x128xf32> to vector<16x128xf32>
      %74 = arith.addf %72, %73 : vector<16x128xf32>
      %cst_45 = arith.constant 1.000000e+00 : f32
      %75 = vector.broadcast %cst_45 : f32 to vector<16x128xf32>
      %76 = arith.addf %74, %75 : vector<16x128xf32>
      %cst_46 = arith.constant 2.000000e+00 : f32
      %77 = vector.broadcast %cst_46 : f32 to vector<16x128xf32>
      %78 = arith.mulf %77, %64 : vector<16x128xf32>
      %cst_47 = arith.constant 1.000000e+00 : f32
      %79 = vector.broadcast %cst_47 : f32 to vector<16x128xf32>
      %80 = arith.addf %78, %79 : vector<16x128xf32>
      %81 = arith.divf %80, %76 : vector<16x128xf32>
      %cst_48 = arith.constant 1.000000e+00 : f32
      %82 = vector.broadcast %cst_48 : f32 to vector<16x128xf32>
      %83 = arith.subf %82, %81 : vector<16x128xf32>
      %cst_49 = arith.constant 1.000000e+00 : f32
      %84 = vector.broadcast %cst_49 : f32 to vector<16x128xf32>
      %85 = arith.mulf %84, %70 : vector<16x128xf32>
      %86 = arith.addf %62, %85 : vector<16x128xf32>
      %cst_50 = arith.constant 1.000000e+00 : f32
      %87 = vector.broadcast %cst_50 : f32 to vector<16x128xf32>
      %88 = arith.mulf %87, %83 : vector<16x128xf32>
      %89 = arith.addf %86, %88 : vector<16x128xf32>
      %c0_51 = arith.constant 0 : index
      %c0_52 = arith.constant 0 : index
      %c0_53 = arith.constant 0 : index
      %90 = vector.load %arg6[%c0_51, %c0_52, %c0_53] : memref<1x16x128xf32, #tpu.memory_space<vmem>>, vector<1x16x128xf32>
      %91 = vector.shape_cast %90 : vector<1x16x128xf32> to vector<16x128xf32>
      %92 = vector.shape_cast %89 : vector<16x128xf32> to vector<1x16x128xf32>
      tpu.vector_store %arg6[%c0_51, %c0_52, %c0_53], %92 {strides = array<i32>} : memref<1x16x128xf32, #tpu.memory_space<vmem>>, vector<1x16x128xf32>,
    } else {
    }
    return
  }
  func.func @transform_0(%arg0: i32, %arg1: i32) -> (i32, i32, i32) {
    %c0_i32 = arith.constant 0 : i32
    %c0_i32_0 = arith.constant 0 : i32
    %c0_i32_1 = arith.constant 0 : i32
    return %arg0, %c0_i32, %c0_i32_0 : i32, i32, i32
  }
  func.func @transform_1(%arg0: i32, %arg1: i32) -> (i32, i32, i32) {
    %c0_i32 = arith.constant 0 : i32
    %c0_i32_0 = arith.constant 0 : i32
    return %arg0, %c0_i32, %arg1 : i32, i32, i32
  }
  func.func @transform_2(%arg0: i32, %arg1: i32) -> (i32, i32, i32) {
    %c0_i32 = arith.constant 0 : i32
    %c0_i32_0 = arith.constant 0 : i32
    return %arg0, %c0_i32, %arg1 : i32, i32, i32
  }
  func.func @transform_3(%arg0: i32, %arg1: i32) -> (i32, i32, i32) {
    %c0_i32 = arith.constant 0 : i32
    %c0_i32_0 = arith.constant 0 : i32
    %c0_i32_1 = arith.constant 0 : i32
    return %arg0, %c0_i32, %c0_i32_0 : i32, i32, i32
  }
  func.func @transform_4(%arg0: i32, %arg1: i32) -> (i32, i32, i32) {
    %c0_i32 = arith.constant 0 : i32
    %c0_i32_0 = arith.constant 0 : i32
    %c0_i32_1 = arith.constant 0 : i32
    return %arg0, %c0_i32, %c0_i32_0 : i32, i32, i32
  }
}

</mosaic_0001>

<bundles_post_ra>
// kernel: hungarian_cost_matrix.1
= control target key start
LH: loop header
LB: loop body
LE: loop exit
PB: predicated region body
PF: predicated region fallthrough
CT: control target
= control target key end

     0   :  { %s1248_s15 = smov 0   ;;  %s1250_s16 = smov 0   ;;  %s1480_s0 = inlined_call_operand.vmem [shape: f32[2,16,19], index: 0, kind: input, shape index: {}]   ;;  %s1481_s1 = inlined_call_operand.vmem [shape: f32[2,16,256], index: 1, kind: input, shape index: {}]   ;;  %s1482_s2 = inlined_call_operand.vmem [shape: bf16[2,128,256], index: 2, kind: input, shape index: {}]   ;;  %s1483_s3 = inlined_call_operand.vmem [shape: f32[2,128,19], index: 3, kind: input, shape index: {}]   ;;  %s1484_s4 = inlined_call_operand.vmem [shape: f32[2,16,128], index: 4, kind: output, shape index: {}]  }
   0x1   :  { %s1252_s17 = smov 0  }
   0x2 LB: > { %s26_s18 = sadd.s32 1, %s1214_s16  ;;  %p953_p0 = scmp.ge.s32.totalorder %s1218_s17, 1  ;;  %s1218_s17 = sphi %s1252_s17, %s14_s17   ;;  %s1214_s16 = sphi %s1250_s16, %s1494_s16   ;;  %s1210_s15 = sphi %s1248_s15, %s1493_s15  }
   0x3   : > { %p28_p1 = scmp.ge.s32.totalorder %s26_s18, 2  ;;  %p218_p2 = scmp.lt.s32.totalorder %s1218_s17, 3 }
   0x5   : > { %s1496_s18 = smov (%p28_p1, %s26_s18), 0  ;;  %p219_p3 = pnand %p953_p0, %p218_p2 }
   0x6   : > { %p267_p4 = scmp.lt.s32.totalorder (!%p219_p3), %s1210_s15, 1  ;;  %vm631_vm0 = vcmask (!%p219_p3), 154624   ;;  %vm313_vm10 = vcmask (!%p219_p3), 7168  }
   0x7   : > { %222 = sbr.rel (%p219_p3) target bundleno = 554 (0x22a), region = 36  ;;  %vm1338_vm1 = vmpackc.low (!%p219_p3), %vm631_vm0, %vm631_vm0 }
   0xe   : > { %s1498_s15 = smov (!%p267_p4, %s1210_s15), 1 }
   0xf   : > { %s1001_s19 = sshll.u32 %s1498_s15, 4  ;;  %s1003_s23 = sshll.u32 %s1498_s15, 7 }
  0x10   : > { %s271_s22 = scalar_lea.vmem %s1480_s0, %s1001_s19  ;;  %s1002_s24 = sshll.u32 %s1498_s15, 5 }
  0x11   : > { %s1281_s27 = scalar_lea.vmem %s1482_s2, %s1003_s23  ;;  %v1283_v0 = vld [vmem:[%s271_s22] sm:$0xff]  ;;  %v1285_v1 = vld [vmem:[%s271_s22 + $0x8] sm:$0xff]  ;;  %s280_s30 = scalar_lea.vmem %s1481_s1, %s1002_s24 }
  0x12   : > { %v632_v2 = vsel %vm631_vm0, %v1283_v0, -inf  ;;  %v635_v3 = vsel %vm631_vm0, %v1285_v1, -inf  ;;  %v1294_v4 = vld [vmem:[%s280_s30] sm:$0xff]  ;;  %v1296_v5 = vld [vmem:[%s280_s30 + $0x8] sm:$0xff]  ;;  %v1301_v7 = vld [vmem:[%s280_s30 + $0x10] sm:$0xff]  ;;  %s1328_s7 = scalar_lea.vmem %s1483_s3, %s1003_s23  ;;  %s301_s10 = scalar_lea.vmem %s1484_s4, %s1001_s19 }
  0x13   : > { %633 = vmax.xlane.f32.xlu0 %v632_v2  ;;  %v1299_v6 = vsub.f32 0.0, %v1294_v4  ;;  %v1304_v8 = vsub.f32 0.0, %v1296_v5  ;;  %v1306_v9 = vld [vmem:[%s280_s30 + $0x18] sm:$0xff]  ;;  %v1309_v10 = vsub.f32 0.0, %v1301_v7  ;;  %v1136_v26 = vld [vmem:[%s1281_s27 + $0x4] ss:$8 sps:$4 sm:$0xff]  }
  0x14   : > { %v1313_v12 = vsub.f32 0.0, %v1306_v9  ;;  %v1138_v27 = vld [vmem:[%s1281_s27] ss:$8 sps:$4 sm:$0xff]   ;;  %v1139_v28 = vld [vmem:[%s1281_s27 + $0x14] ss:$8 sps:$4 sm:$0xff]   ;;  %544 = vmatprep.subr.bf16.mxu0 %v1136_v26  ;;  %v456_v40 = vpack.c.bf16 %v1306_v9, %v1296_v5 }
  0x15   : > { %v354_v11 = vand.u32 2147483647, %v1299_v6  ;;  %v355_v13 = vand.u32 2147483647, %v1304_v8  ;;  %v356_v14 = vand.u32 2147483647, %v1309_v10  ;;  %545 = vmatpush1.bf16.xpose.msra.mxu0 %v1138_v27  ;;  %vm346_vm4 = vcmp.ne.f32.partialorder %v1299_v6, %v1299_v6 }
  0x16   : > { %v357_v16 = vand.u32 2147483647, %v1313_v12  ;;  %546 = vmatprep.subr.bf16.mxu0 %v1139_v28  ;;  %v1141_v36 = vld [vmem:[%s1281_s27 + $0x10] ss:$8 sps:$4 sm:$0xff]   ;;  %v1142_v38 = vld [vmem:[%s1281_s27 + $0x24] ss:$8 sps:$4 sm:$0xff]   ;;  %576 = vmatprep.mubr.bf16.mxu0 %v456_v40  ;;  %vm347_vm5 = vcmp.ne.f32.partialorder %v1304_v8, %v1304_v8  ;;  %vm348_vm8 = vcmp.ne.f32.partialorder %v1309_v10, %v1309_v10  ;;  %vm349_vm9 = vcmp.ne.f32.partialorder %v1313_v12, %v1313_v12 }
  0x17   : > { %636 = vmax.xlane.f32.xlu0 %v635_v3  ;;  %v358_v15 = vsub.f32 0.0, %v354_v11  ;;  %v359_v17 = vsub.f32 0.0, %v355_v13  ;;  %v360_v18 = vsub.f32 0.0, %v356_v14  ;;  %v615_v39 = vld [vmem:[%s1328_s7] sm:$0xff]  ;;  %v616_v45 = vld [vmem:[%s1328_s7 + $0x8] sm:$0xff]  ;;  %v342_v50 = vmax.f32 %v1299_v6, 0.0 }
  0x18   : > { %v361_v20 = vsub.f32 0.0, %v357_v16  ;;  %v1059_v49 = vpack.c.bf16 %v616_v45, %v615_v39  ;;  %v343_v51 = vmax.f32 %v1304_v8, 0.0  ;;  %v617_v52 = vld [vmem:[%s1328_s7 + $0x10] sm:$0xff]  ;;  %v618_v53 = vld [vmem:[%s1328_s7 + $0x18] sm:$0xff]  ;;  %v1144_v54 = vld [vmem:[%s1281_s27 + $0x20] ss:$8 sps:$4 sm:$0xff]  }
  0x19   : > { %v362_v19 = vmul.f32 1.442695, %v358_v15  ;;  %v364_v21 = vmul.f32 1.442695, %v359_v17  ;;  %v366_v22 = vmul.f32 1.442695, %v360_v18  ;;  %v1065_v58 = vpack.c.bf16 %v618_v53, %v617_v52 }
  0x1a   : > { %v368_v23 = vmul.f32 1.442695, %v361_v20  ;;  %1061 = vmatprep.subr.msk.bf16.mxu1 %vm1338_vm1, %v1059_v49  ;;  %v619_v13 = vld [vmem:[%s1328_s7 + $0x20] sm:$0xff]  ;;  %v620_v14 = vld [vmem:[%s1328_s7 + $0x28] sm:$0xff]  ;;  %v1145_v16 = vld [vmem:[%s1281_s27 + $0x34] ss:$8 sps:$4 sm:$0xff]  }
  0x1b   : > { %1160 = vpow2.f32 %v362_v19  ;;  %1064 = vmatpush3.bf16.xpose.msk.msra.mxu1 %vm1338_vm1, %v1059_v49  ;;  %v344_v18 = vmax.f32 %v1309_v10, 0.0  ;;  %v345_v28 = vmax.f32 %v1313_v12, 0.0  ;;  %v621_v39 = vld [vmem:[%s1328_s7 + $0x30] sm:$0xff]  ;;  %v622_v40 = vld [vmem:[%s1328_s7 + $0x38] sm:$0xff]  ;;  %v623_v53 = vld [vmem:[%s1328_s7 + $0x40] sm:$0xff] }
  0x1c   : > { %1162 = vpow2.f32 %v364_v21  ;;  %1067 = vmatprep.subr.msk.bf16.mxu1 %vm1338_vm1, %v1065_v58 }
  0x1d   : > { %1164 = vpow2.f32 %v366_v22  ;;  %547 = vmatpush1.bf16.xpose.msra.mxu0 %v1141_v36 }
  0x1e   : > { %1166 = vpow2.f32 %v368_v23  ;;  %548 = vmatprep.subr.bf16.mxu0 %v1142_v38  ;;  %v1147_v38 = vld [vmem:[%s1281_s27 + $0x30] ss:$8 sps:$4 sm:$0xff]  }
  0x23   : > { %1070 = vmatpush3.bf16.xpose.msk.msra.mxu1 %vm1338_vm1, %v1065_v58 }
  0x25   : > { %v1161_v24 = vpop.eup %1160  ;;  %549 = vmatpush1.bf16.xpose.msra.mxu0 %v1144_v54  ;;  %v624_v54 = vld [vmem:[%s1328_s7 + $0x48] sm:$0xff] }
  0x26   : > { %v1163_v25 = vpop.eup %1162  ;;  %v370_v29 = vadd.f32 1.0, %v1161_v24  ;;  %v373_v33 = vmul.f32 -0.5, %v1161_v24  ;;  %v376_v43 = vand.u32 2147483647, %v1161_v24  ;;  %550 = vmatprep.subr.bf16.mxu0 %v1145_v16  ;;  %v1157_v16 = vld [vmem:[%s1281_s27 + $0x74] ss:$8 sps:$4 sm:$0xff]  }
  0x27   : > { %v1165_v30 = vpop.eup %1164  ;;  %v379_v31 = vadd.f32 1.0, %v1163_v25  ;;  %v382_v34 = vmul.f32 -0.5, %v1163_v25  ;;  %v385_v47 = vand.u32 2147483647, %v1163_v25 }
  0x28   : > { %v1321_v32 = vpop.eup %1166  ;;  %1168 = vlog2.f32 %v370_v29  ;;  %v388_v35 = vadd.f32 1.0, %v1165_v30  ;;  %v374_v42 = vadd.f32 1.0, %v373_v33  ;;  %v391_v44 = vmul.f32 -0.5, %v1165_v30 }
  0x29   : > { %1170 = vlog2.f32 %v379_v31  ;;  %v397_v37 = vadd.f32 1.0, %v1321_v32  ;;  %v383_v46 = vadd.f32 1.0, %v382_v34  ;;  %v400_v48 = vmul.f32 -0.5, %v1321_v32 }
  0x2a   : > { %1172 = vlog2.f32 %v388_v35  ;;  %v375_v55 = vmul.f32 %v1161_v24, %v374_v42  ;;  %v392_v56 = vadd.f32 1.0, %v391_v44  ;;  %v394_v57 = vand.u32 2147483647, %v1165_v30  ;;  %v1148_v44 = vld [vmem:[%s1281_s27 + $0x44] ss:$8 sps:$4 sm:$0xff]  }
  0x2b   : > { %1174 = vlog2.f32 %v397_v37  ;;  %vm1353_vm2 = vcmp.lt.f32.partialorder %v376_v43, 0.0004427343  ;;  %v384_v61 = vmul.f32 %v1163_v25, %v383_v46  ;;  %vm1357_vm3 = vcmp.lt.f32.partialorder %v385_v47, 0.0004427343 }
  0x2c   : > { %v401_v63 = vadd.f32 1.0, %v400_v48  ;;  %v403_v11 = vand.u32 2147483647, %v1321_v32  ;;  %v393_v19 = vmul.f32 %v1165_v30, %v392_v56  ;;  %vm1374_vm6 = vcmp.lt.f32.partialorder %v394_v57, 0.0004427343 }
  0x2d   : > { %v1071_v25 = vpack.c.bf16 %v620_v14, %v619_v13  ;;  %551 = vmatpush1.bf16.xpose.msra.mxu0 %v1147_v38 }
  0x2e   : > { %v402_v24 = vmul.f32 %v1321_v32, %v401_v63  ;;  %vm404_vm7 = vcmp.lt.f32.partialorder %v403_v11, 0.0004427343  ;;  %552 = vmatprep.subr.bf16.mxu0 %v1148_v44  ;;  %v1153_v63 = vld [vmem:[%s1281_s27 + $0x50] ss:$8 sps:$4 sm:$0xff]   ;;  %v1154_v11 = vld [vmem:[%s1281_s27 + $0x64] ss:$8 sps:$4 sm:$0xff]  }
  0x2f   : > { %1073 = vmatprep.subr.msk.bf16.mxu1 %vm1338_vm1, %v1071_v25 }
  0x30   : > { %1076 = vmatpush3.bf16.xpose.msk.msra.mxu1 %vm1338_vm1, %v1071_v25 }
  0x32   : > { %v1169_v59 = vpop.eup %1168 }
  0x33   : > { %v1171_v2 = vpop.eup %1170  ;;  %v372_v3 = vmul.f32 0.6931472, %v1169_v59 }
  0x34   : > { %v381_v15 = vmul.f32 0.6931472, %v1171_v2  ;;  %v1173_v21 = vpop.eup %1172  ;;  %v625_v2 = vld [vmem:[%s1328_s7 + $0x50] sm:$0xff] }
  0x35   : > { %v378_v17 = vsel %vm1353_vm2, %v375_v55, %v372_v3  ;;  %v1175_v26 = vpop.eup %1174  ;;  %v390_v29 = vmul.f32 0.6931472, %v1173_v21  ;;  %v1083_v55 = vpack.c.bf16 %v624_v54, %v623_v53  ;;  %v626_v3 = vld [vmem:[%s1328_s7 + $0x58] sm:$0xff]  ;;  %v1220_v21 = vmov 1065369472  }
  0x36   : > { %v387_v22 = vsel %vm1357_vm3, %v384_v61, %v381_v15  ;;  %v406_v23 = vadd.f32 %v378_v17, %v342_v50  ;;  %v399_v31 = vmul.f32 0.6931472, %v1175_v26  ;;  %v1077_v50 = vpack.c.bf16 %v622_v40, %v621_v39  ;;  %v1156_v15 = vld [vmem:[%s1281_s27 + $0x60] ss:$8 sps:$4 sm:$0xff]   ;;  %v1159_v17 = vld [vmem:[%s1281_s27 + $0x70] ss:$8 sps:$4 sm:$0xff]  }
  0x37   : > { %v407_v27 = vadd.f32 %v387_v22, %v343_v51  ;;  %v396_v34 = vsel %vm1374_vm6, %v393_v19, %v390_v29  ;;  %v1089_v14 = vpack.c.bf16 %v626_v3, %v625_v2 }
  0x38   : > { %v410_v30 = vsel %vm346_vm4, %v1299_v6, %v406_v23  ;;  %v405_v35 = vsel %vm404_vm7, %v402_v24, %v399_v31  ;;  %v408_v36 = vadd.f32 %v396_v34, %v344_v18  ;;  %1079 = vmatprep.subr.msk.bf16.mxu1 %vm1338_vm1, %v1077_v50  ;;  %v455_v18 = vpack.c.bf16 %v1301_v7, %v1294_v4 }
  0x39   : > { %v411_v32 = vsel %vm347_vm5, %v1304_v8, %v407_v27  ;;  %v414_v33 = vsub.f32 0.0, %v410_v30  ;;  %v409_v37 = vadd.f32 %v405_v35, %v345_v28  ;;  %v428_v57 = vadd.f32 %v410_v30, %v1294_v4  ;;  %1082 = vmatpush3.bf16.xpose.msk.msra.mxu1 %vm1338_vm1, %v1077_v50  ;;  %v628_v30 = vld [vmem:[%s1328_s7 + $0x68] sm:$0xff] }
  0x3a   : > { %v415_v6 = vsub.f32 0.0, %v411_v32  ;;  %v412_v43 = vsel %vm348_vm8, %v1309_v10, %v408_v36  ;;  %v429_v58 = vadd.f32 %v411_v32, %v1296_v5  ;;  %1085 = vmatprep.subr.msk.bf16.mxu1 %vm1338_vm1, %v1083_v55  ;;  %v630_v32 = vld [vmem:[%s1328_s7 + $0x78] sm:$0xff]  ;;  %v1221_v34 = vmov 0.0  }
  0x3b   : > { %v418_v8 = vmul.f32 1.442695, %v414_v33  ;;  %v413_v45 = vsel %vm349_vm9, %v1313_v12, %v409_v37  ;;  %v416_v46 = vsub.f32 0.0, %v412_v43  ;;  %v430_v47 = vadd.f32 %v412_v43, %v1301_v7  ;;  %v1150_v12 = vld [vmem:[%s1281_s27 + $0x40] ss:$8 sps:$4 sm:$0xff]   ;;  %317 = vst.msk [vmem:[#allocation4 + $0x8] sm:$0xff] %vm313_vm10, %v1221_v34 }
  0x3c   : > { %v420_v42 = vmul.f32 1.442695, %v415_v6  ;;  %v417_v48 = vsub.f32 0.0, %v413_v45  ;;  %v431_v49 = vadd.f32 %v413_v45, %v1306_v9  ;;  %v1151_v9 = vld [vmem:[%s1281_s27 + $0x54] ss:$8 sps:$4 sm:$0xff]   ;;  %553 = vmatpush1.bf16.xpose.msra.mxu0 %v1150_v12  ;;  %v432_v62 = vadd.f32 %v429_v58, %v428_v57  ;;  %314 = vst.msk [vmem:[#allocation3] sm:$0xff] %vm313_vm10, %v1221_v34 }
  0x3d   : > { %1176 = vpow2.f32 %v418_v8  ;;  %v422_v51 = vmul.f32 1.442695, %v416_v46  ;;  %554 = vmatprep.subr.bf16.mxu0 %v1151_v9  ;;  %315 = vst.msk [vmem:[#allocation3 + $0x8] sm:$0xff] %vm313_vm10, %v1221_v34  ;;  %316 = vst.msk [vmem:[#allocation4] sm:$0xff] %vm313_vm10, %v1221_v34  ;;  %v1222_v6 = vmov 0  }
  0x3e   : > { %1178 = vpow2.f32 %v420_v42  ;;  %v424_v52 = vmul.f32 1.442695, %v417_v48  ;;  %v1408_v10 = vadd.f32 %v431_v49, %v430_v47  ;;  %1135 = vset.pattern.permute.xlu1 %v1222_v6  ;;  %1134 = vset.pattern.permute.xlu0 %v1222_v6 }
  0x3f   : > { %1180 = vpow2.f32 %v422_v51 }
  0x40   : > { %1182 = vpow2.f32 %v424_v52 }
  0x41   : > { %1088 = vmatpush3.bf16.xpose.msk.msra.mxu1 %vm1338_vm1, %v1083_v55 }
  0x42   : > { %1091 = vmatprep.subr.msk.bf16.mxu1 %vm1338_vm1, %v1089_v14  ;;  %v444_v43 = vld [vmem:[#allocation4 + $0x8] sm:$0xff] }
  0x43   : > { %v426_v37 = vld [vmem:[#allocation3] sm:$0xff] }
  0x44   : > { %555 = vmatpush1.bf16.xpose.msra.mxu0 %v1153_v63  ;;  %v443_v35 = vld [vmem:[#allocation4] sm:$0xff]  ;;  %v427_v46 = vld [vmem:[#allocation3 + $0x8] sm:$0xff] }
  0x45   : > { %556 = vmatprep.subr.bf16.mxu0 %v1154_v11 }
  0x47   : > { %v1177_v56 = vpop.eup %1176 }
  0x48   : > { %v1179_v59 = vpop.eup %1178 }
  0x49   : > { %v445_v60 = vadd.f32 %v1179_v59, %v1177_v56  ;;  %v1181_v61 = vpop.eup %1180  ;;  %1094 = vmatpush3.bf16.xpose.msk.msra.mxu1 %vm1338_vm1, %v1089_v14 }
  0x4a   : > { %v1183_v5 = vpop.eup %1182  ;;  %v457_v20 = vpack.c.bf16 %v1181_v61, %v1177_v56 }
  0x4b   : > { %446 = vadd.xlane.f32.xlu0 %v445_v60  ;;  %v448_v13 = vadd.f32 %v1183_v5, %v1181_v61  ;;  %v458_v19 = vpack.c.bf16 %v1183_v5, %v1179_v59 }
  0x4c   : > { %557 = vmatpush1.bf16.xpose.msra.mxu0 %v1156_v15 }
  0x4d   : > { %558 = vmatprep.subr.bf16.mxu0 %v1157_v16 }
  0x4f   : > { %433 = vadd.xlane.f32.xlu0 %v432_v62 }
  0x54   : > { %559 = vmatpush1.bf16.xpose.msra.mxu0 %v1159_v17 }
  0x5b   : > { %577 = vmatmul.mubr.bf16.vlgmr.msra.gmra.mrb[0].mxu0 %v455_v18 }
  0x5c   : > { %584 = vmatprep.mubr.bf16.mxu0 %v458_v19 }
  0x63   : > { %585 = vmatmul.mubr.bf16.gmra.mrb[4].mxu0 %v457_v20 }
  0x64   : > { %592 = vmatprep.mubr.bf16.mxu0 %v1220_v21 }
  0x6b   : > { %593 = vmatmul.mubr.bf16.gmra.mrb[8].mxu0 %v1220_v21 }
  0xa0   : > { %v634_v22 = vpop.xlane.xlu0 %633 }
  0xa1   : > { %v638_v23 = vsub.f32 %v1283_v0, %v634_v22  ;;  %v627_v0 = vld [vmem:[%s1328_s7 + $0x60] sm:$0xff] }
  0xa2   : > { %v1095_v31 = vpack.c.bf16 %v628_v30, %v627_v0 }
  0xa3   : > { %v640_v24 = vmul.f32 1.442695, %v638_v23 }
  0xa4   : > { %v637_v25 = vpop.xlane.xlu0 %636  ;;  %1097 = vmatprep.subr.msk.bf16.mxu1 %vm1338_vm1, %v1095_v31 }
  0xa5   : > { %1184 = vpow2.f32 %v640_v24  ;;  %v639_v26 = vsub.f32 %v1285_v1, %v637_v25  ;;  %1100 = vmatpush3.bf16.xpose.msk.msra.mxu1 %vm1338_vm1, %v1095_v31  ;;  %v629_v1 = vld [vmem:[%s1328_s7 + $0x70] sm:$0xff] }
  0xa6   : > { %v1101_v33 = vpack.c.bf16 %v630_v32, %v629_v1 }
  0xa7   : > { %v642_v4 = vmul.f32 1.442695, %v639_v26 }
  0xa8   : > { %1103 = vmatprep.subr.msk.bf16.mxu1 %vm1338_vm1, %v1101_v33 }
  0xa9   : > { %1186 = vpow2.f32 %v642_v4 }
  0xad   : > { %1106 = vmatpush3.bf16.xpose.msk.msra.mxu1 %vm1338_vm1, %v1101_v33 }
  0xaf   : > { %v1185_v7 = vpop.eup %1184 }
  0xb0   : > { %v644_v27 = vsel %vm631_vm0, %v1185_v7, 0.0 }
  0xb1   : > { %645 = vadd.xlane.f32.xlu1 %v644_v27 }
  0xb3   : > { %v1187_v28 = vpop.eup %1186 }
  0xb4   : > { %v647_v29 = vsel %vm631_vm0, %v1187_v28, 0.0 }
  0xb5   : > { %648 = vadd.xlane.f32.xlu1 %v647_v29 }
  0xb9   : > { %449 = vadd.xlane.f32.xlu1 %v448_v13 }
  0xbd   : > { %436 = vadd.xlane.f32.xlu1 %v1408_v10 }
  0xd8   : > { %v447_v36 = vpop.xlane.xlu0 %446 }
  0xd9   : > { %v451_v8 = vadd.f32 %v447_v36, %v443_v35 }
  0xdb   : > { %453 = vst.msk [vmem:[#allocation4] sm:$0xff] %vm313_vm10, %v451_v8 }
  0xdc   : > { %v434_v41 = vpop.xlane.xlu0 %433 }
  0xdd   : > { %v438_v38 = vadd.f32 %v434_v41, %v426_v37 }
  0xdf   : > { %441 = vst.msk [vmem:[#allocation3] sm:$0xff] %vm313_vm10, %v438_v38 }
  0xe2   : > { %v675_v39 = vld [vmem:[#allocation4] sm:$0xff] }
  0xe3   : > { %679 = vperm.xlu0 %1134, %v675_v39  }
  0xe6   : > { %v659_v55 = vld [vmem:[#allocation3] sm:$0xff] }
 0x12e   : > { %v578_v50 = vpop.f32.mrb[0].mxu0 }
 0x12f   : > { %v580_v52 = vpop.f32.mrb[1].mxu0 }
 0x130   : > { %v581_v10 = vpop.f32.mrb[2].mxu0 }
 0x131   : > { %v583_v53 = vpop.f32.mrb[3].mxu0 }
 0x136   : > { %v586_v56 = vpop.f32.mrb[4].mxu0 }
 0x137   : > { %v588_v57 = vpop.f32.mrb[5].mxu0  ;;  %v695_v19 = vmul.f32 2.0, %v586_v56 }
 0x138   : > { %v589_v58 = vpop.f32.mrb[6].mxu0 }
 0x139   : > { %v591_v59 = vpop.f32.mrb[7].mxu0  ;;  %v696_v18 = vmul.f32 2.0, %v589_v58  ;;  %v697_v23 = vadd.f32 1.0, %v695_v19 }
 0x13b   : > { %v698_v21 = vadd.f32 1.0, %v696_v18 }
 0x13e   : > { %v646_v40 = vpop.xlane.xlu1 %645  ;;  %v594_v61 = vpop.f32.mrb[8].mxu0 }
 0x13f   : > { %1188 = vrcp.f32 %v646_v40  ;;  %v596_v62 = vpop.f32.mrb[9].mxu0  ;;  %609 = vst [vmem:[#allocation2 + $0x20] sm:$0xff] %v594_v61 }
 0x140   : > { %v597_v63 = vpop.f32.mrb[10].mxu0 }
 0x141   : > { %v598_v2 = vpop.f32.mrb[11].mxu0 }
 0x142   : > { %v649_v42 = vpop.xlane.xlu1 %648 }
 0x143   : > { %1190 = vrcp.f32 %v649_v42 }
 0x146   : > { %v450_v44 = vpop.xlane.xlu1 %449  ;;  %v980_v3 = vld [vmem:[#allocation2 + $0x20] ss:$0 sm:$0xff] }
 0x147   : > { %v452_v45 = vadd.f32 %v450_v44, %v444_v43 }
 0x149   : > { %v1189_v47 = vpop.eup %1188  ;;  %454 = vst.msk [vmem:[#allocation4 + $0x8] sm:$0xff] %vm313_vm10, %v452_v45 }
 0x14a   : > { %v652_v48 = vmul.f32 %v1189_v47, %v1185_v7  ;;  %v437_v49 = vpop.xlane.xlu1 %436 }
 0x14b   : > { %v439_v51 = vadd.f32 %v437_v49, %v427_v46 }
 0x14c   : > { %1056 = vmatprep.mubr.msk.f32.mxu1 %vm631_vm0, %v652_v48 }
 0x14d   : > { %v1191_v12 = vpop.eup %1190  ;;  %442 = vst.msk [vmem:[#allocation3 + $0x8] sm:$0xff] %vm313_vm10, %v439_v51 }
 0x14e   : > { %v653_v54 = vmul.f32 %v1191_v12, %v1187_v28 }
 0x150   : > { %1057 = vmatmul.mubr.msk.f32.vlgmr.msra.gmra.mrb[0].mxu1 %vm631_vm0, %v653_v54  ;;  %v676_v9 = vld [vmem:[#allocation4 + $0x8] sm:$0xff] }
 0x151   : > { %684 = vperm.xlu1 %1135, %v676_v9  }
 0x154   : > { %v660_v60 = vld [vmem:[#allocation3 + $0x8] sm:$0xff] }
 0x155   : > { %663 = vperm.xlu1 %1135, %v659_v55  }
 0x159   : > { %668 = vperm.xlu1 %1135, %v660_v60  }
 0x162   : > { %v680_v5 = vpop.permute.xlu0 %679 }
 0x163   : > { %v691_v14 = vadd.f32 %v980_v3, %v680_v5 }
 0x165   : > { %v693_v16 = vadd.f32 1.0, %v691_v14 }
 0x1d0   : > { %v685_v11 = vpop.permute.xlu1 %684 }
 0x1d1   : > { %v692_v13 = vadd.f32 %v980_v3, %v685_v11 }
 0x1d3   : > { %v694_v15 = vadd.f32 1.0, %v692_v13 }
 0x1d4   : > { %v664_v17 = vpop.permute.xlu1 %663 }
 0x1d5   : > { %1192 = vrcp.f32 %v694_v15  ;;  %v671_v26 = vsub.f32 %v664_v17, %v578_v50 }
 0x1d6   : > { %1194 = vrcp.f32 %v693_v16 }
 0x1d7   : > { %v673_v28 = vmul.f32 0.00390625, %v671_v26 }
 0x1d8   : > { %v669_v20 = vpop.permute.xlu1 %668 }
 0x1d9   : > { %v672_v25 = vsub.f32 %v669_v20, %v581_v10 }
 0x1db   : > { %v674_v27 = vmul.f32 0.00390625, %v672_v25 }
 0x1df   : > { %v1193_v22 = vpop.eup %1192 }
 0x1e0   : > { %v1195_v24 = vpop.eup %1194  ;;  %v702_v4 = vmul.f32 %v1193_v22, %v698_v21 }
 0x1e1   : > { %v700_v7 = vmul.f32 %v1195_v24, %v697_v23 }
 0x1e2   : > { %v704_v0 = vsub.f32 1.0, %v702_v4 }
 0x1e3   : > { %v703_v1 = vsub.f32 1.0, %v700_v7 }
 0x223   : > { %v1058_v29 = vpop.f32.mrb[0].mxu1 }
 0x224   : > { %v831_v30 = vadd.f32 %v1058_v29, %v674_v27  ;;  %v825_v31 = vpop.f32.mrb[1].mxu1 }
 0x225   : > { %v826_v32 = vadd.f32 %v825_v31, %v673_v28 }
 0x226   : > { %v835_v33 = vadd.f32 %v831_v30, %v704_v0 }
 0x227   : > { %v834_v34 = vadd.f32 %v826_v32, %v703_v1 }
 0x228   : > { %837 = vst [vmem:[%s301_s10 + $0x8] sm:$0xff] %v835_v33 }
 0x229   : > { %836 = vst [vmem:[%s301_s10] sm:$0xff] %v834_v34 }
 0x22a PF: > { %s14_s17 = sadd.s32 1, %s1218_s17   ;;  %s1493_s15 = smov %s1214_s16 }
 0x22b   : > { %p11_p5 = scmp.ge.s32.totalorder %s14_s17, 4   ;;  %s1494_s16 = smov %s1496_s18 }
 0x22d   :  { %13 = sbr.rel (!%p11_p5) target bundleno = 2 (0x2), region = 83 }

</bundles_post_ra>
